<compile_context>
chip_gen: v7x
topology: tpu7x:2x2x1
jax: 0.10.0
libtpu: 0.0.40
codegen_flags: <defaults>
</compile_context>

<pallas_src>
import functools

import jax
import jax.numpy as jnp
from jax.experimental import pallas as pl
from jax.experimental.pallas import tpu as pltpu


def _fftnet_fused_kernel(*refs, shifts, c_ins, has_h, fft_channels):
    """Fused forward: all FFTNetBlocks + final 1x1 conv, one batch element."""
    n_layers = len(shifts)
    n_per_layer = 5 if has_h else 4

    idx = 0
    x_ref = refs[idx]; idx += 1
    h_ref = None
    if has_h:
        h_ref = refs[idx]; idx += 1
    layer_refs = []
    for _ in range(n_layers):
        layer_refs.append(refs[idx:idx + n_per_layer])
        idx += n_per_layer
    w_fin_ref = refs[idx]
    b_fin_ref = refs[idx + 1]
    o_ref = refs[idx + 2]

    C = fft_channels
    act = x_ref[0]                                    # (T, C_in0), resident
    h_full = h_ref[0] if has_h else None              # (T_h, C_h)

    # Statically unrolled over layers (weights are tiny; everything stays
    # on-chip between layers).
    for li in range(n_layers):
        shift = shifts[li]
        c_in = c_ins[li]
        if has_h:
            w_x2_ref, w_h2_ref, b_in_ref, w_out_ref, b_out_ref = layer_refs[li]
        else:
            w_x2_ref, b_in_ref, w_out_ref, b_out_ref = layer_refs[li]
            w_h2_ref = None

        t_cur = act.shape[0]
        t_out = t_cur - shift

        # x branch: single matmul over the full window with N-stacked weights
        # [w_xl | w_xr] -> (c_in, 2C); the time shift is applied on the output.
        w_x2 = w_x2_ref[...]
        if c_in == 1:
            y_x = act * w_x2                           # (t_cur, 2C), VPU bcast
        else:
            y_x = jnp.dot(act, w_x2, preferred_element_type=jnp.float32)
        z = y_x[:t_out, :C] + y_x[shift:shift + t_out, C:] + b_in_ref[...]

        if has_h:
            # PyTorch: h = h[:, :, -x.size(-1):]
            hh = h_full[h_full.shape[0] - t_cur:, :]   # (t_cur, C_h)
            y_h = jnp.dot(hh, w_h2_ref[...], preferred_element_type=jnp.float32)
            z = z + y_h[:t_out, :C] + y_h[shift:shift + t_out, C:]

        z = jnp.maximum(z, 0.0)
        act = jnp.dot(z, w_out_ref[...],
                      preferred_element_type=jnp.float32) + b_out_ref[...]
        act = jnp.maximum(act, 0.0)

    # Final fft_channels -> out_channels 1x1 conv fused as the epilogue.
    out = jnp.dot(act, w_fin_ref[...],
                  preferred_element_type=jnp.float32) + b_fin_ref[...]
    o_ref[0] = out.astype(o_ref.dtype)


class FFTNetPallas:
    """JAX/Pallas reimplementation of FFTNet (out_type='Gaussian')."""

    def __init__(self, key, n_stacks=3, fft_channels=32, out_channels=2,
                 local_condition_channels=None):
        self.n_stacks = n_stacks
        self.fft_channels = fft_channels
        self.out_channels = out_channels
        self.local_condition_channels = local_condition_channels
        self.window_shifts = [2 ** i for i in range(n_stacks)]
        self.receptive_field = sum(self.window_shifts) + 1
        # Layers are processed with the largest shift first (reversed), and the
        # first processed layer has in_channels == 1.
        self.layer_shifts = list(reversed(self.window_shifts))
        self.layer_cins = [1] + [fft_channels] * (n_stacks - 1)

        def conv_params(k, cin, cout):
            k1, k2 = jax.random.split(k)
            bound = 1.0 / (cin ** 0.5)
            w = jax.random.uniform(k1, (cin, cout), jnp.float32, -bound, bound)
            b = jax.random.uniform(k2, (1, cout), jnp.float32, -bound, bound)
            return w, b

        C = fft_channels
        has_h = local_condition_channels is not None
        keys = jax.random.split(key, n_stacks + 1)
        self.layer_params = []
        for i, (shift, cin) in enumerate(zip(self.layer_shifts, self.layer_cins)):
            sub = jax.random.split(keys[i], 5)
            w_xl, b_xl = conv_params(sub[0], cin, C)
            w_xr, b_xr = conv_params(sub[1], cin, C)
            w_x2 = jnp.concatenate([w_xl, w_xr], axis=1)          # (cin, 2C)
            b_in = b_xl + b_xr                                    # folded bias
            if has_h:
                w_hl, b_hl = conv_params(sub[2], local_condition_channels, C)
                w_hr, b_hr = conv_params(sub[3], local_condition_channels, C)
                w_h2 = jnp.concatenate([w_hl, w_hr], axis=1)      # (C_h, 2C)
                b_in = b_in + b_hl + b_hr
            w_out, b_out = conv_params(sub[4], C, C)
            if has_h:
                self.layer_params.append((w_x2, w_h2, b_in, w_out, b_out))
            else:
                self.layer_params.append((w_x2, b_in, w_out, b_out))
        self.w_final, self.b_final = conv_params(keys[-1], C, out_channels)

    def __call__(self, x, h=None):
        # x: (B, T, 1) channels-last.  h: (B, C_h, T) channels-first (as in the
        # PyTorch forward); transposed to channels-last for the kernel.
        has_h = h is not None
        assert has_h == (self.local_condition_channels is not None)
        B, T, _ = x.shape
        T_final = T - sum(self.layer_shifts)

        inputs = [x]
        in_specs = [pl.BlockSpec((1, T, x.shape[2]), lambda b: (b, 0, 0))]
        if has_h:
            h_btc = jnp.transpose(h, (0, 2, 1))
            T_h, C_h = h_btc.shape[1], h_btc.shape[2]
            inputs.append(h_btc)
            in_specs.append(pl.BlockSpec((1, T_h, C_h), lambda b: (b, 0, 0)))

        def add_param(p):
            inputs.append(p)
            in_specs.append(
                pl.BlockSpec(p.shape, lambda b, nd=p.ndim: (0,) * nd))

        for params in self.layer_params:
            for arr in params:
                add_param(arr)
        add_param(self.w_final)
        add_param(self.b_final)

        kernel = functools.partial(
            _fftnet_fused_kernel,
            shifts=tuple(self.layer_shifts),
            c_ins=tuple(self.layer_cins),
            has_h=has_h,
            fft_channels=self.fft_channels,
        )
        # TODO(synk): for realistic audio T, add a time-tile grid axis with a
        # halo of sum(shifts) and cap tiles for v7x's 64 MiB VMEM.
        return pl.pallas_call(
            kernel,
            out_shape=jax.ShapeDtypeStruct(
                (B, T_final, self.out_channels), jnp.float32),
            grid=(B,),
            in_specs=in_specs,
            out_specs=pl.BlockSpec(
                (1, T_final, self.out_channels), lambda b: (b, 0, 0)),
            compiler_params=pltpu.CompilerParams(
                dimension_semantics=("parallel",)),
        )(*inputs)


def _reference_forward(model, x, h):
    """Pure-JAX reference mirroring the PyTorch semantics (channels-last)."""
    C = model.fft_channels
    hp = jax.lax.Precision.HIGHEST
    has_h = h is not None
    act = x
    h_btc = None if h is None else jnp.transpose(h, (0, 2, 1))
    for params, shift, c_in in zip(model.layer_params, model.layer_shifts,
                                   model.layer_cins):
        if has_h:
            w_x2, w_h2, b_in, w_out, b_out = params
        else:
            w_x2, b_in, w_out, b_out = params
        t_cur = act.shape[1]
        t_out = t_cur - shift
        if c_in == 1:
            y_x = act * w_x2[None]
        else:
            y_x = jnp.einsum("btc,cd->btd", act, w_x2, precision=hp)
        z = y_x[:, :t_out, :C] + y_x[:, shift:shift + t_out, C:] + b_in[None]
        if has_h:
            hh = h_btc[:, h_btc.shape[1] - t_cur:, :]
            y_h = jnp.einsum("btc,cd->btd", hh, w_h2, precision=hp)
            z = z + y_h[:, :t_out, :C] + y_h[:, shift:shift + t_out, C:]
        z = jnp.maximum(z, 0.0)
        act = jnp.maximum(
            jnp.einsum("btc,cd->btd", z, w_out, precision=hp) + b_out[None], 0.0)
    return (jnp.einsum("btc,cd->btd", act, model.w_final, precision=hp)
            + model.b_final[None])


if __name__ == "__main__":
    key = jax.random.PRNGKey(0)
    k_param, k_x, k_h = jax.random.split(key, 3)

    B, T = 2, 16
    n_stacks, fft_channels, out_channels = 3, 32, 2
    lc_channels = 8

    model = FFTNetPallas(k_param, n_stacks=n_stacks, fft_channels=fft_channels,
                         out_channels=out_channels,
                         local_condition_channels=lc_channels)

    x = jax.random.normal(k_x, (B, T, 1), dtype=jnp.float32)
    h = jax.random.normal(k_h, (B, lc_channels, T), dtype=jnp.float32)

    out = model(x, h)
    jax.block_until_ready(out)

    T_final = T - sum(model.window_shifts)
    assert out.shape == (B, T_final, out_channels), out.shape

    ref = _reference_forward(model, x, h)
    assert jnp.allclose(out, ref, atol=2e-2, rtol=2e-2), (
        float(jnp.max(jnp.abs(out - ref))))

    print("KERNEL_OK")
</pallas_src>

<mosaic_0001>
module attributes {stable_mosaic.version = 11 : i64} {
  func.func @_fftnet_fused_kernel(%arg0: i32, %arg1: memref<1x16x1xf32, #tpu.memory_space<vmem>>, %arg2: memref<1x16x8xf32, #tpu.memory_space<vmem>>, %arg3: memref<1x64xf32, #tpu.memory_space<vmem>>, %arg4: memref<8x64xf32, #tpu.memory_space<vmem>>, %arg5: memref<1x32xf32, #tpu.memory_space<vmem>>, %arg6: memref<32x32xf32, #tpu.memory_space<vmem>>, %arg7: memref<1x32xf32, #tpu.memory_space<vmem>>, %arg8: memref<32x64xf32, #tpu.memory_space<vmem>>, %arg9: memref<8x64xf32, #tpu.memory_space<vmem>>, %arg10: memref<1x32xf32, #tpu.memory_space<vmem>>, %arg11: memref<32x32xf32, #tpu.memory_space<vmem>>, %arg12: memref<1x32xf32, #tpu.memory_space<vmem>>, %arg13: memref<32x64xf32, #tpu.memory_space<vmem>>, %arg14: memref<8x64xf32, #tpu.memory_space<vmem>>, %arg15: memref<1x32xf32, #tpu.memory_space<vmem>>, %arg16: memref<32x32xf32, #tpu.memory_space<vmem>>, %arg17: memref<1x32xf32, #tpu.memory_space<vmem>>, %arg18: memref<32x2xf32, #tpu.memory_space<vmem>>, %arg19: memref<1x2xf32, #tpu.memory_space<vmem>>, %arg20: memref<1x9x2xf32, #tpu.memory_space<vmem>>) attributes {dimension_semantics = [#tpu.dimension_semantics<parallel>], iteration_bounds = array<i64: 2>, scalar_prefetch = 0 : i64, scratch_operands = 0 : i64, tpu.core_type = #tpu.core_type<tc>, window_params = [{transform_indices = @transform_0, window_bounds = array<i64: 1, 16, 1>}, {transform_indices = @transform_1, window_bounds = array<i64: 1, 16, 8>}, {pipeline_mode = #tpu.pipeline_mode<synchronous>, transform_indices = @transform_2, window_bounds = array<i64: 1, 64>}, {pipeline_mode = #tpu.pipeline_mode<synchronous>, transform_indices = @transform_3, window_bounds = array<i64: 8, 64>}, {pipeline_mode = #tpu.pipeline_mode<synchronous>, transform_indices = @transform_4, window_bounds = array<i64: 1, 32>}, {pipeline_mode = #tpu.pipeline_mode<synchronous>, transform_indices = @transform_5, window_bounds = array<i64: 32, 32>}, {pipeline_mode = #tpu.pipeline_mode<synchronous>, transform_indices = @transform_6, window_bounds = array<i64: 1, 32>}, {pipeline_mode = #tpu.pipeline_mode<synchronous>, transform_indices = @transform_7, window_bounds = array<i64: 32, 64>}, {pipeline_mode = #tpu.pipeline_mode<synchronous>, transform_indices = @transform_8, window_bounds = array<i64: 8, 64>}, {pipeline_mode = #tpu.pipeline_mode<synchronous>, transform_indices = @transform_9, window_bounds = array<i64: 1, 32>}, {pipeline_mode = #tpu.pipeline_mode<synchronous>, transform_indices = @transform_10, window_bounds = array<i64: 32, 32>}, {pipeline_mode = #tpu.pipeline_mode<synchronous>, transform_indices = @transform_11, window_bounds = array<i64: 1, 32>}, {pipeline_mode = #tpu.pipeline_mode<synchronous>, transform_indices = @transform_12, window_bounds = array<i64: 32, 64>}, {pipeline_mode = #tpu.pipeline_mode<synchronous>, transform_indices = @transform_13, window_bounds = array<i64: 8, 64>}, {pipeline_mode = #tpu.pipeline_mode<synchronous>, transform_indices = @transform_14, window_bounds = array<i64: 1, 32>}, {pipeline_mode = #tpu.pipeline_mode<synchronous>, transform_indices = @transform_15, window_bounds = array<i64: 32, 32>}, {pipeline_mode = #tpu.pipeline_mode<synchronous>, transform_indices = @transform_16, window_bounds = array<i64: 1, 32>}, {pipeline_mode = #tpu.pipeline_mode<synchronous>, transform_indices = @transform_17, window_bounds = array<i64: 32, 2>}, {pipeline_mode = #tpu.pipeline_mode<synchronous>, transform_indices = @transform_18, window_bounds = array<i64: 1, 2>}, {transform_indices = @transform_19, window_bounds = array<i64: 1, 9, 2>}]} {
    %c0 = arith.constant 0 : index
    %c0_0 = arith.constant 0 : index
    %c0_1 = arith.constant 0 : index
    %0 = vector.load %arg1[%c0, %c0_0, %c0_1] : memref<1x16x1xf32, #tpu.memory_space<vmem>>, vector<1x16x1xf32>
    %1 = vector.shape_cast %0 : vector<1x16x1xf32> to vector<16x1xf32>
    %c0_2 = arith.constant 0 : index
    %c0_3 = arith.constant 0 : index
    %c0_4 = arith.constant 0 : index
    %2 = vector.load %arg2[%c0_2, %c0_3, %c0_4] : memref<1x16x8xf32, #tpu.memory_space<vmem>>, vector<1x16x8xf32>
    %3 = vector.shape_cast %2 : vector<1x16x8xf32> to vector<16x8xf32>
    %c0_5 = arith.constant 0 : index
    %c0_6 = arith.constant 0 : index
    %4 = vector.load %arg3[%c0_5, %c0_6] : memref<1x64xf32, #tpu.memory_space<vmem>>, vector<1x64xf32>
    %5 = vector.broadcast %1 : vector<16x1xf32> to vector<16x64xf32>
    %6 = vector.broadcast %4 : vector<1x64xf32> to vector<16x64xf32>
    %7 = arith.mulf %5, %6 : vector<16x64xf32>
    %8 = vector.extract_strided_slice %7 {offsets = [0, 0], sizes = [12, 32], strides = [1, 1]} : vector<16x64xf32> to vector<12x32xf32>
    %9 = vector.extract_strided_slice %7 {offsets = [4, 32], sizes = [12, 32], strides = [1, 1]} : vector<16x64xf32> to vector<12x32xf32>
    %10 = arith.addf %8, %9 : vector<12x32xf32>
    %c0_7 = arith.constant 0 : index
    %c0_8 = arith.constant 0 : index
    %11 = vector.load %arg5[%c0_7, %c0_8] : memref<1x32xf32, #tpu.memory_space<vmem>>, vector<1x32xf32>
    %12 = vector.broadcast %11 : vector<1x32xf32> to vector<12x32xf32>
    %13 = arith.addf %10, %12 : vector<12x32xf32>
    %c0_9 = arith.constant 0 : index
    %c0_10 = arith.constant 0 : index
    %14 = vector.load %arg4[%c0_9, %c0_10] : memref<8x64xf32, #tpu.memory_space<vmem>>, vector<8x64xf32>
    %cst = arith.constant dense<0.000000e+00> : vector<16x64xf32>
    %15 = tpu.matmul %3, %14, %cst {dimension_numbers = #tpu.dot_dimension_numbers<[1], [0], [0], [1], [0, 0, 1, 1], [], []>} : vector<16x8xf32>, vector<8x64xf32>, vector<16x64xf32> -> vector<16x64xf32>
    %16 = vector.extract_strided_slice %15 {offsets = [0, 0], sizes = [12, 32], strides = [1, 1]} : vector<16x64xf32> to vector<12x32xf32>
    %17 = arith.addf %13, %16 : vector<12x32xf32>
    %18 = vector.extract_strided_slice %15 {offsets = [4, 32], sizes = [12, 32], strides = [1, 1]} : vector<16x64xf32> to vector<12x32xf32>
    %19 = arith.addf %17, %18 : vector<12x32xf32>
    %cst_11 = arith.constant 0.000000e+00 : f32
    %20 = vector.broadcast %cst_11 : f32 to vector<12x32xf32>
    %21 = arith.maximumf %19, %20 : vector<12x32xf32>
    %c0_12 = arith.constant 0 : index
    %c0_13 = arith.constant 0 : index
    %22 = vector.load %arg6[%c0_12, %c0_13] : memref<32x32xf32, #tpu.memory_space<vmem>>, vector<32x32xf32>
    %cst_14 = arith.constant dense<0.000000e+00> : vector<12x32xf32>
    %23 = tpu.matmul %21, %22, %cst_14 {dimension_numbers = #tpu.dot_dimension_numbers<[1], [0], [0], [1], [0, 0, 1, 1], [], []>} : vector<12x32xf32>, vector<32x32xf32>, vector<12x32xf32> -> vector<12x32xf32>
    %c0_15 = arith.constant 0 : index
    %c0_16 = arith.constant 0 : index
    %24 = vector.load %arg7[%c0_15, %c0_16] : memref<1x32xf32, #tpu.memory_space<vmem>>, vector<1x32xf32>
    %25 = vector.broadcast %24 : vector<1x32xf32> to vector<12x32xf32>
    %26 = arith.addf %23, %25 : vector<12x32xf32>
    %cst_17 = arith.constant 0.000000e+00 : f32
    %27 = vector.broadcast %cst_17 : f32 to vector<12x32xf32>
    %28 = arith.maximumf %26, %27 : vector<12x32xf32>
    %c0_18 = arith.constant 0 : index
    %c0_19 = arith.constant 0 : index
    %29 = vector.load %arg8[%c0_18, %c0_19] : memref<32x64xf32, #tpu.memory_space<vmem>>, vector<32x64xf32>
    %cst_20 = arith.constant dense<0.000000e+00> : vector<12x64xf32>
    %30 = tpu.matmul %28, %29, %cst_20 {dimension_numbers = #tpu.dot_dimension_numbers<[1], [0], [0], [1], [0, 0, 1, 1], [], []>} : vector<12x32xf32>, vector<32x64xf32>, vector<12x64xf32> -> vector<12x64xf32>
    %31 = vector.extract_strided_slice %30 {offsets = [0, 0], sizes = [10, 32], strides = [1, 1]} : vector<12x64xf32> to vector<10x32xf32>
    %32 = vector.extract_strided_slice %30 {offsets = [2, 32], sizes = [10, 32], strides = [1, 1]} : vector<12x64xf32> to vector<10x32xf32>
    %33 = arith.addf %31, %32 : vector<10x32xf32>
    %c0_21 = arith.constant 0 : index
    %c0_22 = arith.constant 0 : index
    %34 = vector.load %arg10[%c0_21, %c0_22] : memref<1x32xf32, #tpu.memory_space<vmem>>, vector<1x32xf32>
    %35 = vector.broadcast %34 : vector<1x32xf32> to vector<10x32xf32>
    %36 = arith.addf %33, %35 : vector<10x32xf32>
    %37 = vector.extract_strided_slice %3 {offsets = [4, 0], sizes = [12, 8], strides = [1, 1]} : vector<16x8xf32> to vector<12x8xf32>
    %c0_23 = arith.constant 0 : index
    %c0_24 = arith.constant 0 : index
    %38 = vector.load %arg9[%c0_23, %c0_24] : memref<8x64xf32, #tpu.memory_space<vmem>>, vector<8x64xf32>
    %cst_25 = arith.constant dense<0.000000e+00> : vector<12x64xf32>
    %39 = tpu.matmul %37, %38, %cst_25 {dimension_numbers = #tpu.dot_dimension_numbers<[1], [0], [0], [1], [0, 0, 1, 1], [], []>} : vector<12x8xf32>, vector<8x64xf32>, vector<12x64xf32> -> vector<12x64xf32>
    %40 = vector.extract_strided_slice %39 {offsets = [0, 0], sizes = [10, 32], strides = [1, 1]} : vector<12x64xf32> to vector<10x32xf32>
    %41 = arith.addf %36, %40 : vector<10x32xf32>
    %42 = vector.extract_strided_slice %39 {offsets = [2, 32], sizes = [10, 32], strides = [1, 1]} : vector<12x64xf32> to vector<10x32xf32>
    %43 = arith.addf %41, %42 : vector<10x32xf32>
    %cst_26 = arith.constant 0.000000e+00 : f32
    %44 = vector.broadcast %cst_26 : f32 to vector<10x32xf32>
    %45 = arith.maximumf %43, %44 : vector<10x32xf32>
    %c0_27 = arith.constant 0 : index
    %c0_28 = arith.constant 0 : index
    %46 = vector.load %arg11[%c0_27, %c0_28] : memref<32x32xf32, #tpu.memory_space<vmem>>, vector<32x32xf32>
    %cst_29 = arith.constant dense<0.000000e+00> : vector<10x32xf32>
    %47 = tpu.matmul %45, %46, %cst_29 {dimension_numbers = #tpu.dot_dimension_numbers<[1], [0], [0], [1], [0, 0, 1, 1], [], []>} : vector<10x32xf32>, vector<32x32xf32>, vector<10x32xf32> -> vector<10x32xf32>
    %c0_30 = arith.constant 0 : index
    %c0_31 = arith.constant 0 : index
    %48 = vector.load %arg12[%c0_30, %c0_31] : memref<1x32xf32, #tpu.memory_space<vmem>>, vector<1x32xf32>
    %49 = vector.broadcast %48 : vector<1x32xf32> to vector<10x32xf32>
    %50 = arith.addf %47, %49 : vector<10x32xf32>
    %cst_32 = arith.constant 0.000000e+00 : f32
    %51 = vector.broadcast %cst_32 : f32 to vector<10x32xf32>
    %52 = arith.maximumf %50, %51 : vector<10x32xf32>
    %c0_33 = arith.constant 0 : index
    %c0_34 = arith.constant 0 : index
    %53 = vector.load %arg13[%c0_33, %c0_34] : memref<32x64xf32, #tpu.memory_space<vmem>>, vector<32x64xf32>
    %cst_35 = arith.constant dense<0.000000e+00> : vector<10x64xf32>
    %54 = tpu.matmul %52, %53, %cst_35 {dimension_numbers = #tpu.dot_dimension_numbers<[1], [0], [0], [1], [0, 0, 1, 1], [], []>} : vector<10x32xf32>, vector<32x64xf32>, vector<10x64xf32> -> vector<10x64xf32>
    %55 = vector.extract_strided_slice %54 {offsets = [0, 0], sizes = [9, 32], strides = [1, 1]} : vector<10x64xf32> to vector<9x32xf32>
    %56 = vector.extract_strided_slice %54 {offsets = [1, 32], sizes = [9, 32], strides = [1, 1]} : vector<10x64xf32> to vector<9x32xf32>
    %57 = arith.addf %55, %56 : vector<9x32xf32>
    %c0_36 = arith.constant 0 : index
    %c0_37 = arith.constant 0 : index
    %58 = vector.load %arg15[%c0_36, %c0_37] : memref<1x32xf32, #tpu.memory_space<vmem>>, vector<1x32xf32>
    %59 = vector.broadcast %58 : vector<1x32xf32> to vector<9x32xf32>
    %60 = arith.addf %57, %59 : vector<9x32xf32>
    %61 = vector.extract_strided_slice %3 {offsets = [6, 0], sizes = [10, 8], strides = [1, 1]} : vector<16x8xf32> to vector<10x8xf32>
    %c0_38 = arith.constant 0 : index
    %c0_39 = arith.constant 0 : index
    %62 = vector.load %arg14[%c0_38, %c0_39] : memref<8x64xf32, #tpu.memory_space<vmem>>, vector<8x64xf32>
    %cst_40 = arith.constant dense<0.000000e+00> : vector<10x64xf32>
    %63 = tpu.matmul %61, %62, %cst_40 {dimension_numbers = #tpu.dot_dimension_numbers<[1], [0], [0], [1], [0, 0, 1, 1], [], []>} : vector<10x8xf32>, vector<8x64xf32>, vector<10x64xf32> -> vector<10x64xf32>
    %64 = vector.extract_strided_slice %63 {offsets = [0, 0], sizes = [9, 32], strides = [1, 1]} : vector<10x64xf32> to vector<9x32xf32>
    %65 = arith.addf %60, %64 : vector<9x32xf32>
    %66 = vector.extract_strided_slice %63 {offsets = [1, 32], sizes = [9, 32], strides = [1, 1]} : vector<10x64xf32> to vector<9x32xf32>
    %67 = arith.addf %65, %66 : vector<9x32xf32>
    %cst_41 = arith.constant 0.000000e+00 : f32
    %68 = vector.broadcast %cst_41 : f32 to vector<9x32xf32>
    %69 = arith.maximumf %67, %68 : vector<9x32xf32>
    %c0_42 = arith.constant 0 : index
    %c0_43 = arith.constant 0 : index
    %70 = vector.load %arg16[%c0_42, %c0_43] : memref<32x32xf32, #tpu.memory_space<vmem>>, vector<32x32xf32>
    %cst_44 = arith.constant dense<0.000000e+00> : vector<9x32xf32>
    %71 = tpu.matmul %69, %70, %cst_44 {dimension_numbers = #tpu.dot_dimension_numbers<[1], [0], [0], [1], [0, 0, 1, 1], [], []>} : vector<9x32xf32>, vector<32x32xf32>, vector<9x32xf32> -> vector<9x32xf32>
    %c0_45 = arith.constant 0 : index
    %c0_46 = arith.constant 0 : index
    %72 = vector.load %arg17[%c0_45, %c0_46] : memref<1x32xf32, #tpu.memory_space<vmem>>, vector<1x32xf32>
    %73 = vector.broadcast %72 : vector<1x32xf32> to vector<9x32xf32>
    %74 = arith.addf %71, %73 : vector<9x32xf32>
    %cst_47 = arith.constant 0.000000e+00 : f32
    %75 = vector.broadcast %cst_47 : f32 to vector<9x32xf32>
    %76 = arith.maximumf %74, %75 : vector<9x32xf32>
    %c0_48 = arith.constant 0 : index
    %c0_49 = arith.constant 0 : index
    %77 = vector.load %arg18[%c0_48, %c0_49] : memref<32x2xf32, #tpu.memory_space<vmem>>, vector<32x2xf32>
    %cst_50 = arith.constant dense<0.000000e+00> : vector<9x2xf32>
    %78 = tpu.matmul %76, %77, %cst_50 {dimension_numbers = #tpu.dot_dimension_numbers<[1], [0], [0], [1], [0, 0, 1, 1], [], []>} : vector<9x32xf32>, vector<32x2xf32>, vector<9x2xf32> -> vector<9x2xf32>
    %c0_51 = arith.constant 0 : index
    %c0_52 = arith.constant 0 : index
    %79 = vector.load %arg19[%c0_51, %c0_52] : memref<1x2xf32, #tpu.memory_space<vmem>>, vector<1x2xf32>
    %80 = vector.broadcast %79 : vector<1x2xf32> to vector<9x2xf32>
    %81 = arith.addf %78, %80 : vector<9x2xf32>
    %c0_53 = arith.constant 0 : index
    %c0_54 = arith.constant 0 : index
    %c0_55 = arith.constant 0 : index
    %82 = vector.load %arg20[%c0_53, %c0_54, %c0_55] : memref<1x9x2xf32, #tpu.memory_space<vmem>>, vector<1x9x2xf32>
    %83 = vector.shape_cast %82 : vector<1x9x2xf32> to vector<9x2xf32>
    %84 = vector.shape_cast %81 : vector<9x2xf32> to vector<1x9x2xf32>
    tpu.vector_store %arg20[%c0_53, %c0_54, %c0_55], %84 {strides = array<i32>} : memref<1x9x2xf32, #tpu.memory_space<vmem>>, vector<1x9x2xf32>,
    return
  }
  func.func @transform_0(%arg0: i32) -> (i32, i32, i32) {
    %c0_i32 = arith.constant 0 : i32
    %c0_i32_0 = arith.constant 0 : i32
    %c0_i32_1 = arith.constant 0 : i32
    return %arg0, %c0_i32, %c0_i32_0 : i32, i32, i32
  }
  func.func @transform_1(%arg0: i32) -> (i32, i32, i32) {
    %c0_i32 = arith.constant 0 : i32
    %c0_i32_0 = arith.constant 0 : i32
    %c0_i32_1 = arith.constant 0 : i32
    return %arg0, %c0_i32, %c0_i32_0 : i32, i32, i32
  }
  func.func @transform_2(%arg0: i32) -> (i32, i32) {
    %c0_i32 = arith.constant 0 : i32
    %c0_i32_0 = arith.constant 0 : i32
    %c0_i32_1 = arith.constant 0 : i32
    return %c0_i32, %c0_i32_0 : i32, i32
  }
  func.func @transform_3(%arg0: i32) -> (i32, i32) {
    %c0_i32 = arith.constant 0 : i32
    %c0_i32_0 = arith.constant 0 : i32
    %c0_i32_1 = arith.constant 0 : i32
    return %c0_i32, %c0_i32_0 : i32, i32
  }
  func.func @transform_4(%arg0: i32) -> (i32, i32) {
    %c0_i32 = arith.constant 0 : i32
    %c0_i32_0 = arith.constant 0 : i32
    %c0_i32_1 = arith.constant 0 : i32
    return %c0_i32, %c0_i32_0 : i32, i32
  }
  func.func @transform_5(%arg0: i32) -> (i32, i32) {
    %c0_i32 = arith.constant 0 : i32
    %c0_i32_0 = arith.constant 0 : i32
    %c0_i32_1 = arith.constant 0 : i32
    return %c0_i32, %c0_i32_0 : i32, i32
  }
  func.func @transform_6(%arg0: i32) -> (i32, i32) {
    %c0_i32 = arith.constant 0 : i32
    %c0_i32_0 = arith.constant 0 : i32
    %c0_i32_1 = arith.constant 0 : i32
    return %c0_i32, %c0_i32_0 : i32, i32
  }
  func.func @transform_7(%arg0: i32) -> (i32, i32) {
    %c0_i32 = arith.constant 0 : i32
    %c0_i32_0 = arith.constant 0 : i32
    %c0_i32_1 = arith.constant 0 : i32
    return %c0_i32, %c0_i32_0 : i32, i32
  }
  func.func @transform_8(%arg0: i32) -> (i32, i32) {
    %c0_i32 = arith.constant 0 : i32
    %c0_i32_0 = arith.constant 0 : i32
    %c0_i32_1 = arith.constant 0 : i32
    return %c0_i32, %c0_i32_0 : i32, i32
  }
  func.func @transform_9(%arg0: i32) -> (i32, i32) {
    %c0_i32 = arith.constant 0 : i32
    %c0_i32_0 = arith.constant 0 : i32
    %c0_i32_1 = arith.constant 0 : i32
    return %c0_i32, %c0_i32_0 : i32, i32
  }
  func.func @transform_10(%arg0: i32) -> (i32, i32) {
    %c0_i32 = arith.constant 0 : i32
    %c0_i32_0 = arith.constant 0 : i32
    %c0_i32_1 = arith.constant 0 : i32
    return %c0_i32, %c0_i32_0 : i32, i32
  }
  func.func @transform_11(%arg0: i32) -> (i32, i32) {
    %c0_i32 = arith.constant 0 : i32
    %c0_i32_0 = arith.constant 0 : i32
    %c0_i32_1 = arith.constant 0 : i32
    return %c0_i32, %c0_i32_0 : i32, i32
  }
  func.func @transform_12(%arg0: i32) -> (i32, i32) {
    %c0_i32 = arith.constant 0 : i32
    %c0_i32_0 = arith.constant 0 : i32
    %c0_i32_1 = arith.constant 0 : i32
    return %c0_i32, %c0_i32_0 : i32, i32
  }
  func.func @transform_13(%arg0: i32) -> (i32, i32) {
    %c0_i32 = arith.constant 0 : i32
    %c0_i32_0 = arith.constant 0 : i32
    %c0_i32_1 = arith.constant 0 : i32
    return %c0_i32, %c0_i32_0 : i32, i32
  }
  func.func @transform_14(%arg0: i32) -> (i32, i32) {
    %c0_i32 = arith.constant 0 : i32
    %c0_i32_0 = arith.constant 0 : i32
    %c0_i32_1 = arith.constant 0 : i32
    return %c0_i32, %c0_i32_0 : i32, i32
  }
  func.func @transform_15(%arg0: i32) -> (i32, i32) {
    %c0_i32 = arith.constant 0 : i32
    %c0_i32_0 = arith.constant 0 : i32
    %c0_i32_1 = arith.constant 0 : i32
    return %c0_i32, %c0_i32_0 : i32, i32
  }
  func.func @transform_16(%arg0: i32) -> (i32, i32) {
    %c0_i32 = arith.constant 0 : i32
    %c0_i32_0 = arith.constant 0 : i32
    %c0_i32_1 = arith.constant 0 : i32
    return %c0_i32, %c0_i32_0 : i32, i32
  }
  func.func @transform_17(%arg0: i32) -> (i32, i32) {
    %c0_i32 = arith.constant 0 : i32
    %c0_i32_0 = arith.constant 0 : i32
    %c0_i32_1 = arith.constant 0 : i32
    return %c0_i32, %c0_i32_0 : i32, i32
  }
  func.func @transform_18(%arg0: i32) -> (i32, i32) {
    %c0_i32 = arith.constant 0 : i32
    %c0_i32_0 = arith.constant 0 : i32
    %c0_i32_1 = arith.constant 0 : i32
    return %c0_i32, %c0_i32_0 : i32, i32
  }
  func.func @transform_19(%arg0: i32) -> (i32, i32, i32) {
    %c0_i32 = arith.constant 0 : i32
    %c0_i32_0 = arith.constant 0 : i32
    %c0_i32_1 = arith.constant 0 : i32
    return %arg0, %c0_i32, %c0_i32_0 : i32, i32, i32
  }
}

</mosaic_0001>

<bundles_post_ra>
// kernel: tpu_custom_call.1
= control target key start
LH: loop header
LB: loop body
LE: loop exit
PB: predicated region body
PF: predicated region fallthrough
CT: control target
= control target key end

     0   :  { %s2783_s0 = inlined_call_operand.vmem [shape: f32[2,16,1], index: 0, kind: input, shape index: {}]   ;;  %s2784_s1 = inlined_call_operand.vmem [shape: f32[2,16,8], index: 1, kind: input, shape index: {}]   ;;  %s2785_s2 = inlined_call_operand.vmem [shape: f32[1,64], index: 2, kind: input, shape index: {}]   ;;  %s2786_s3 = inlined_call_operand.hbm [shape: f32[8,64], index: 3, kind: input, shape index: {}]   ;;  %s2787_s4 = inlined_call_operand.hbm [shape: f32[1,32], index: 4, kind: input, shape index: {}]   ;;  %s2788_s5 = inlined_call_operand.vmem [shape: f32[32,32], index: 5, kind: input, shape index: {}]   ;;  %s2789_s6 = inlined_call_operand.hbm [shape: f32[1,32], index: 6, kind: input, shape index: {}]   ;;  %s2790_s7 = inlined_call_operand.vmem [shape: f32[32,64], index: 7, kind: input, shape index: {}]   ;;  %s2791_s8 = inlined_call_operand.hbm [shape: f32[8,64], index: 8, kind: input, shape index: {}]   ;;  %s2792_s9 = inlined_call_operand.hbm [shape: f32[1,32], index: 9, kind: input, shape index: {}]   ;;  %s2793_s10 = inlined_call_operand.vmem [shape: f32[32,32], index: 10, kind: input, shape index: {}]   ;;  %s2794_s11 = inlined_call_operand.hbm [shape: f32[1,32], index: 11, kind: input, shape index: {}]   ;;  %s2795_s12 = inlined_call_operand.vmem [shape: f32[32,64], index: 12, kind: input, shape index: {}]   ;;  %s2796_s13 = inlined_call_operand.hbm [shape: f32[8,64], index: 13, kind: input, shape index: {}]   ;;  %s2797_s14 = inlined_call_operand.vmem [shape: f32[1,32], index: 14, kind: input, shape index: {}]   ;;  %s2798_s15 = inlined_call_operand.vmem [shape: f32[32,32], index: 15, kind: input, shape index: {}]   ;;  %s2799_s16 = inlined_call_operand.vmem [shape: f32[1,32], index: 16, kind: input, shape index: {}]   ;;  %s2800_s17 = inlined_call_operand.vmem [shape: f32[32,2], index: 17, kind: input, shape index: {}]   ;;  %s2801_s18 = inlined_call_operand.vmem [shape: f32[1,2], index: 18, kind: input, shape index: {}]   ;;  %s2802_s19 = inlined_call_operand.vmem [shape: f32[2,9,2], index: 19, kind: output, shape index: {}]  }
   0x1   :  { %2807 = sst [smem:[#allocation18_spill]] %s2783_s0 }
   0x2   :  { %2808 = sst [smem:[#allocation19_spill]] %s2784_s1 }
   0x3   :  { %2809 = sst [smem:[#allocation20_spill]] %s2785_s2 }
   0x4   :  { %2810 = sst [smem:[#allocation21_spill]] %s2786_s3 }
   0x5   :  { %2811 = sst [smem:[#allocation22_spill]] %s2787_s4 }
   0x6   :  { %2812 = sst [smem:[#allocation23_spill]] %s2801_s18 }
   0x7   :  { %2813 = sst [smem:[#allocation24_spill]] %s2802_s19 }
   0x8   :  { %24 = vsyncpa [#allocation3], 0 }
   0x9   :  { %25 = vsyncpa [#allocation5], 0 }
   0xa   :  { %26 = vsyncpa [#allocation8], 0 }
   0xb   :  { %27 = vsyncpa [#allocation11], 0  ;;  %s2430_s0 = smov 0  }
   0xc LB: > { %2814 = sst [smem:[#allocation17_spill]] %s2319_s0  ;;  %s2321_s30 = smov [#allocation4]   ;;  %s2319_s0 = sphi %s2430_s0, %s33_s0  }
   0xd   : > { %s500_s20 = sshll.u32 %s2321_s30, 4  ;;  %s2436_s21 = sadd.s32 4294967295, %s2319_s0   ;;  %s2441_s20 = int_to_ptr.vmem [resolvable:$true] %s500_s20 }
   0xe   : > { %p1791_p0 = scmp.ge.s32.totalorder %s2319_s0, 1  ;;  %p473_p1 = scmp.lt.s32.totalorder %s2319_s0, 3 }
   0xf   : > { %p2805_p2 = scmp.eq.s32.totalorder %s2436_s21, 0  ;;  %s2322_s22 = smov [#allocation7]  }
  0x10   : > { %p2443_p3 = pnand %p1791_p0, %p473_p1  ;;  %s528_s2 = sshll.u32 %s2322_s22, 4  ;;  %s2449_s2 = int_to_ptr.vmem [resolvable:$true] %s528_s2 }
  0x11   : > { %s2323_s23 = smov [#allocation10]   ;;  %s2324_s3 = smov [#allocation2]  }
  0x12   : > { %s2815_s1 = scalar_select %p2443_p3, 1, 0 }
  0x13   : > { %p2047_p4 = pneg %p2443_p3  ;;  %s553_s24 = sshll.u32 %s2323_s23, 4  ;;  %s2457_s24 = int_to_ptr.vmem [resolvable:$true] %s553_s24 }
  0x14   : > { %s489_s26 = sshll.u32 %s2324_s3, 4  ;;  %s2817_s4 = sld [smem:[#allocation22_spill]]  ;;  %s2459_s26 = int_to_ptr.vmem [resolvable:$true] %s489_s26 }
  0x15   : > { %p2453_p5 = pnand %p2805_p2, %p2047_p4 }
  0x17   : > { %p2469_p7 = pneg %p2453_p5 }
  0x1a   : > { %s2101_s29 = scalar_lea.hbm %s2817_s4, 16 }
  0x1b   : > { %p2102_p6 = scmp.ne.s32.totalorder %s2817_s4, %s2101_s29  ;;  %p2108_p10 = scmp.lt.u32.totalorder %s2101_s29, %s2817_s4 }
  0x1d   : > { %p2104_p8 = pnand %p2469_p7, %p2102_p6 }
  0x1f   : > { %p2105_p9 = pneg %p2104_p8 }
  0x21   : > { %p2110_p11 = pnand %p2108_p10, %p2105_p9 }
  0x23   : > { %2113 = shalt.err (!%p2110_p11)
}
  0x24   : > { %s2114_s27 = scalar_lea.vmem %s2441_s20, 16  ;;  %s2121_s28 = scalar_lea.vmem %s2441_s20, 32 }
  0x25   : > { %p2115_p12 = scmp.ne.s32.totalorder %s2441_s20, %s2114_s27  ;;  %p2122_p1 = scmp.lt.s32.totalorder %s2441_s20, %s2441_s20 }
  0x26   : > { %p2123_p4 = scmp.lt.s32.totalorder %s2121_s28, %s2114_s27 }
  0x27   : > { %p2117_p13 = pnand %p2115_p12, %p2469_p7 }
  0x28   : > { %p2124_p6 = por %p2123_p4, %p2122_p1 }
  0x29   : > { %p2118_p0 = pneg %p2117_p13 }
  0x2b   : > { %p2125_p8 = pnand %p2124_p6, %p2118_p0 }
  0x2d   : > { %2128 = shalt.err (!%p2125_p8)
}
  0x2e   : > { %2053 = dma.hbm_to_vmem [thread:$0]  (!%p2453_p5), %s2817_s4, 16, %s2441_s20, [#allocation5]  }
  0x2f   : > { %s2129_s3 = scalar_lea.hbm %s2791_s8, 128 }
  0x30   : > { %p2130_p9 = scmp.ne.s32.totalorder %s2791_s8, %s2129_s3  ;;  %p2136_p12 = scmp.lt.u32.totalorder %s2129_s3, %s2791_s8 }
  0x32   : > { %p2132_p10 = pnand %p2130_p9, %p2469_p7 }
  0x34   : > { %p2133_p11 = pneg %p2132_p10 }
  0x36   : > { %p2138_p13 = pnand %p2136_p12, %p2133_p11 }
  0x38   : > { %2141 = shalt.err (!%p2138_p13)
}
  0x39   : > { %s2142_s20 = scalar_lea.vmem %s2449_s2, 128  ;;  %p2150_p6 = scmp.lt.s32.totalorder %s2449_s2, %s2449_s2 }
  0x3a   : > { %p2143_p0 = scmp.ne.s32.totalorder %s2449_s2, %s2142_s20  ;;  %p2151_p8 = scmp.lt.s32.totalorder %s2142_s20, %s2142_s20 }
  0x3c   : > { %p2145_p1 = pnand %p2143_p0, %p2469_p7  ;;  %p2152_p9 = por %p2151_p8, %p2150_p6 }
  0x3e   : > { %p2146_p4 = pneg %p2145_p1 }
  0x40   : > { %p2153_p10 = pnand %p2152_p9, %p2146_p4 }
  0x42   : > { %2156 = shalt.err (!%p2153_p10)
}
  0x43   : > { %2059 = dma.hbm_to_vmem [thread:$0]  (!%p2453_p5), %s2791_s8, 128, %s2449_s2, [#allocation8]  }
  0x44   : > { %s2157_s30 = scalar_lea.hbm %s2794_s11, 16 }
  0x45   : > { %p2158_p11 = scmp.ne.s32.totalorder %s2794_s11, %s2157_s30  ;;  %p2164_p0 = scmp.lt.u32.totalorder %s2157_s30, %s2794_s11 }
  0x47   : > { %p2160_p12 = pnand %p2158_p11, %p2469_p7 }
  0x49   : > { %p2161_p13 = pneg %p2160_p12 }
  0x4b   : > { %p2166_p1 = pnand %p2164_p0, %p2161_p13 }
  0x4d   : > { %2169 = shalt.err (!%p2166_p1)
}
  0x4e   : > { %s2170_s2 = scalar_lea.vmem %s2457_s24, 16  ;;  %s2177_s20 = scalar_lea.vmem %s2457_s24, 32 }
  0x4f   : > { %p2171_p4 = scmp.ne.s32.totalorder %s2457_s24, %s2170_s2  ;;  %p2178_p9 = scmp.lt.s32.totalorder %s2457_s24, %s2457_s24 }
  0x50   : > { %p2179_p10 = scmp.lt.s32.totalorder %s2177_s20, %s2170_s2 }
  0x51   : > { %p2173_p6 = pnand %p2171_p4, %p2469_p7 }
  0x52   : > { %p2180_p11 = por %p2179_p10, %p2178_p9 }
  0x53   : > { %p2174_p8 = pneg %p2173_p6 }
  0x55   : > { %p2181_p12 = pnand %p2180_p11, %p2174_p8 }
  0x57   : > { %2184 = shalt.err (!%p2181_p12)
}
  0x58   : > { %2065 = dma.hbm_to_vmem [thread:$0]  (!%p2453_p5), %s2794_s11, 16, %s2457_s24, [#allocation11]  }
  0x59   : > { %s2819_s30 = sld [smem:[#allocation21_spill]] }
  0x5f   : > { %s2185_s22 = scalar_lea.hbm %s2819_s30, 128 }
  0x60   : > { %p2186_p13 = scmp.ne.s32.totalorder %s2819_s30, %s2185_s22  ;;  %p2192_p4 = scmp.lt.u32.totalorder %s2185_s22, %s2819_s30 }
  0x62   : > { %p2188_p0 = pnand %p2186_p13, %p2469_p7 }
  0x64   : > { %p2189_p1 = pneg %p2188_p0 }
  0x66   : > { %p2194_p6 = pnand %p2192_p4, %p2189_p1 }
  0x68   : > { %2197 = shalt.err (!%p2194_p6)
}
  0x69   : > { %s2198_s24 = scalar_lea.vmem %s2459_s26, 128  ;;  %p2206_p11 = scmp.lt.s32.totalorder %s2459_s26, %s2459_s26 }
  0x6a   : > { %p2199_p8 = scmp.ne.s32.totalorder %s2459_s26, %s2198_s24  ;;  %p2207_p12 = scmp.lt.s32.totalorder %s2198_s24, %s2198_s24 }
  0x6c   : > { %p2201_p9 = pnand %p2199_p8, %p2469_p7  ;;  %p2208_p13 = por %p2207_p12, %p2206_p11 }
  0x6e   : > { %p2202_p10 = pneg %p2201_p9 }
  0x70   : > { %p2209_p0 = pnand %p2208_p13, %p2202_p10 }
  0x72   : > { %2212 = shalt.err (!%p2209_p0)
}
  0x73   : > { %2050 = dma.hbm_to_vmem [thread:$0]  (!%p2453_p5), %s2819_s30, 128, %s2459_s26, [#allocation3]  }
  0x74   : > { %s2325_s19 = smov [#allocation6]   ;;  %s2326_s29 = smov [#allocation9]  }
  0x75   : > { %s514_s0 = sshll.u32 %s2325_s19, 4  ;;  %s539_s22 = sshll.u32 %s2326_s29, 4  ;;  %s515_s0 = int_to_ptr.vmem [resolvable:$true] %s514_s0  ;;  %s540_s22 = int_to_ptr.vmem [resolvable:$true] %s539_s22 }
  0x76   : > { %s2213_s28 = scalar_lea.hbm %s2789_s6, 16 }
  0x77   : > { %p2214_p1 = scmp.ne.s32.totalorder %s2789_s6, %s2213_s28  ;;  %p2220_p8 = scmp.lt.u32.totalorder %s2213_s28, %s2789_s6 }
  0x79   : > { %p2216_p4 = pnand %p2214_p1, %p2469_p7 }
  0x7b   : > { %p2217_p6 = pneg %p2216_p4 }
  0x7d   : > { %p2222_p9 = pnand %p2220_p8, %p2217_p6 }
  0x7f   : > { %2225 = shalt.err (!%p2222_p9)
}
  0x80   : > { %s2226_s26 = scalar_lea.vmem %s515_s0, 16  ;;  %s2233_s18 = scalar_lea.vmem %s515_s0, 32 }
  0x81   : > { %p2227_p10 = scmp.ne.s32.totalorder %s515_s0, %s2226_s26  ;;  %p2234_p13 = scmp.lt.s32.totalorder %s515_s0, %s515_s0 }
  0x82   : > { %p2235_p0 = scmp.lt.s32.totalorder %s2233_s18, %s2226_s26 }
  0x83   : > { %p2229_p11 = pnand %p2227_p10, %p2469_p7 }
  0x84   : > { %p2236_p2 = por %p2235_p0, %p2234_p13 }
  0x85   : > { %p2230_p12 = pneg %p2229_p11 }
  0x87   : > { %p2237_p3 = pnand %p2236_p2, %p2230_p12 }
  0x89   : > { %2240 = shalt.err (!%p2237_p3)
}
  0x8a   : > { %2056 = dma.hbm_to_vmem [thread:$0]  (!%p2453_p5), %s2789_s6, 16, %s515_s0, [#allocation5]  }
  0x8b   : > { %s2241_s27 = scalar_lea.hbm %s2792_s9, 16 }
  0x8c   : > { %p2242_p1 = scmp.ne.s32.totalorder %s2792_s9, %s2241_s27  ;;  %p2248_p3 = scmp.lt.u32.totalorder %s2241_s27, %s2792_s9 }
  0x8e   : > { %p2244_p4 = pnand %p2242_p1, %p2469_p7 }
  0x90   : > { %p2245_p2 = pneg %p2244_p4 }
  0x92   : > { %p2250_p6 = pnand %p2248_p3, %p2245_p2 }
  0x94   : > { %2253 = shalt.err (!%p2250_p6)
}
  0x95   : > { %s2254_s26 = scalar_lea.vmem %s540_s22, 16  ;;  %s2261_s0 = scalar_lea.vmem %s540_s22, 32 }
  0x96   : > { %p2255_p8 = scmp.ne.s32.totalorder %s540_s22, %s2254_s26  ;;  %p2262_p11 = scmp.lt.s32.totalorder %s540_s22, %s540_s22 }
  0x97   : > { %p2263_p12 = scmp.lt.s32.totalorder %s2261_s0, %s2254_s26 }
  0x98   : > { %p2257_p9 = pnand %p2255_p8, %p2469_p7 }
  0x99   : > { %p2264_p13 = por %p2263_p12, %p2262_p11 }
  0x9a   : > { %p2258_p10 = pneg %p2257_p9 }
  0x9c   : > { %p2265_p0 = pnand %p2264_p13, %p2258_p10 }
  0x9e   : > { %2268 = shalt.err (!%p2265_p0)
}
  0x9f   : > { %2062 = dma.hbm_to_vmem [thread:$0]  (!%p2453_p5), %s2792_s9, 16, %s540_s22, [#allocation8]  }
  0xa0   : > { %s2327_s29 = smov [#allocation12]   ;;  %s2269_s28 = scalar_lea.hbm %s2796_s13, 128 }
  0xa1   : > { %s567_s4 = sshll.u32 %s2327_s29, 4  ;;  %p2270_p1 = scmp.ne.s32.totalorder %s2796_s13, %s2269_s28  ;;  %s568_s4 = int_to_ptr.vmem [resolvable:$true] %s567_s4 }
  0xa2   : > { %p2276_p3 = scmp.lt.u32.totalorder %s2269_s28, %s2796_s13 }
  0xa3   : > { %p2272_p4 = pnand %p2270_p1, %p2469_p7 }
  0xa5   : > { %p2273_p2 = pneg %p2272_p4 }
  0xa7   : > { %p2278_p6 = pnand %p2276_p3, %p2273_p2 }
  0xa9   : > { %2281 = shalt.err (!%p2278_p6)
}
  0xaa   : > { %s2282_s22 = scalar_lea.vmem %s568_s4, 128  ;;  %p2290_p11 = scmp.lt.s32.totalorder %s568_s4, %s568_s4 }
  0xab   : > { %p2283_p8 = scmp.ne.s32.totalorder %s568_s4, %s2282_s22  ;;  %p2291_p12 = scmp.lt.s32.totalorder %s2282_s22, %s2282_s22 }
  0xad   : > { %p2285_p9 = pnand %p2283_p8, %p2469_p7  ;;  %p2292_p13 = por %p2291_p12, %p2290_p11 }
  0xaf   : > { %p2286_p10 = pneg %p2285_p9 }
  0xb1   : > { %p2293_p0 = pnand %p2292_p13, %p2286_p10 }
  0xb3   : > { %2296 = shalt.err (!%p2293_p0)
}
  0xb4   : > { %2068 = dma.hbm_to_vmem [thread:$0]  (!%p2453_p5), %s2796_s13, 128, %s568_s4, [#allocation11]  }
  0xb5   : > { %p2820_p1 = scmp.ne.s32.totalorder %s2815_s1, 0 }
  0xb6   : > { %p2821_p4 = scmp.eq.s32.totalorder (!%p2820_p1), %s2436_s21, 0 }
  0xb7   : > { %611 = sbr.rel (%p2820_p1) target bundleno = 2100 (0x834), region = 96 }
  0xbe   : > { %2302 = dma.done.wait (%p2821_p4), [#allocation3], 128   ;;  %p2822_p7 = pmov %p2821_p4 }
  0xbf   : > { %p2823_p2 = pmov %p2821_p4 }
  0xc0   : > { %2304 = vsyncadd (%p2822_p7), [#allocation3], 4294967168 }
  0xc1   : > { %2306 = dma.done.wait (%p2823_p2), [#allocation5], 32   ;;  %p2824_p3 = pmov %p2823_p2 }
  0xc2   : > { %p2825_p6 = pmov %p2823_p2 }
  0xc3   : > { %2308 = vsyncadd (%p2824_p3), [#allocation5], 4294967264 }
  0xc4   : > { %2310 = dma.done.wait (%p2825_p6), [#allocation8], 144   ;;  %p2826_p5 = pmov %p2823_p2 }
  0xc5   : > { %p2827_p8 = pmov %p2823_p2 }
  0xc6   : > { %2312 = vsyncadd (%p2826_p5), [#allocation8], 4294967152 }
  0xc7   : > { %2314 = dma.done.wait (%p2827_p8), [#allocation11], 144   ;;  %p2828_p9 = pmov %p2823_p2 }
  0xc8   : > { %p696_p10 = scmp.lt.s32.totalorder %s2436_s21, 1  ;;  %v2328_v0 = vmov 0   ;;  %s2829_s19 = sld [smem:[#allocation18_spill]]  ;;  %vm758_vm0 = vcmask 64512   ;;  %v757_v1 = vld [vmem:[#allocation2] sm:$0xff]  ;;  %v858_v10 = vld [vmem:[%s2788_s5 + $0x8] sm:$0xff] }
  0xc9   : > { %2316 = vsyncadd (%p2828_p9), [#allocation11], 4294967152  ;;  %2100 = vset.pattern.permute.xlu0 %v2328_v0  ;;  %s2830_s27 = sld [smem:[#allocation19_spill]]  ;;  %1890 = vmatprep.subr.mxu0 %v757_v1  ;;  %s2831_s24 = sld [smem:[#allocation20_spill]]  ;;  %v857_v9 = vld [vmem:[%s2788_s5] sm:$0xff]  ;;  %vm736_vm1 = vcmask 1043456  }
  0xca   : > { %s2836_s21 = smov (!%p696_p10, %s2436_s21), 1  ;;  %1891 = vmatpush3.msra.mxu0 %v757_v1  ;;  %v1971_v12 = vpack.c.bf16 %v858_v10, %v857_v9  ;;  %s2329_s18 = smov 96   ;;  %v859_v17 = vld [vmem:[%s2788_s5 + $0x10] sm:$0xff]  ;;  %v860_v18 = vld [vmem:[%s2788_s5 + $0x18] sm:$0xff]  ;;  %v952_v20 = vld [vmem:[%s2790_s7] sm:$0xff]  ;;  %vm868_vm2 = vcmask 261120  }
  0xcb   : > { %s2635_s1 = sshll.u32 %s2836_s21, 4  ;;  %v1975_v19 = vpack.c.bf16 %v860_v18, %v859_v17  ;;  %v953_v21 = vld [vmem:[%s2790_s7 + $0x8] sm:$0xff]  ;;  %v954_v43 = vld [vmem:[%s2790_s7 + $0x10] sm:$0xff]  ;;  %v955_v44 = vld [vmem:[%s2790_s7 + $0x18] sm:$0xff]  ;;  %vm1039_vm3 = vcmask 1045504   ;;  %vm1363_vm4 = vcmask 1041408  }
  0xcc   : > { %1972 = vmatprep.subr.bf16.mxu1 %v1971_v12  ;;  %v1979_v22 = vpack.c.bf16 %v953_v21, %v952_v20  ;;  %v1815_v32 = vld [vmem:[#allocation4] ss:$0 sm:$0xff]  ;;  %v1983_v45 = vpack.c.bf16 %v955_v44, %v954_v43  ;;  %v1060_v48 = vld [vmem:[#allocation7] sm:$0xff]  ;;  %v1818_v50 = vld [vmem:[#allocation6] ss:$0 sm:$0xff]  ;;  %vm1341_vm5 = vcmask 1046528  }
  0xcd   : > { %1974 = vmatpush3.bf16.msra.mxu1 %v1971_v12  ;;  %v1160_v62 = vld [vmem:[%s2793_s10] sm:$0xff]  ;;  %v1161_v63 = vld [vmem:[%s2793_s10 + $0x8] sm:$0xff]  ;;  %v1162_v1 = vld [vmem:[%s2793_s10 + $0x10] sm:$0xff]  ;;  %s2832_s4 = sld [smem:[#allocation23_spill]]  ;;  %vm1651_vm6 = vcmask 8192   ;;  %vm1649_vm7 = vcmask 15360  }
  0xce   : > { %s700_s29 = scalar_lea.vmem %s2829_s19, %s2635_s1  ;;  %1976 = vmatprep.subr.bf16.mxu1 %v1975_v19  ;;  %1980 = vmatprep.subr.bf16.mxu0 %v1979_v22  ;;  %v1987_v0 = vpack.c.bf16 %v1161_v63, %v1160_v62  ;;  %v1254_v10 = vld [vmem:[%s2795_s12] sm:$0xff] }
  0xcf   : > { %s705_s28 = scalar_lea.vmem %s2830_s27, %s2635_s1  ;;  %v711_v2 = vld [vmem:[%s700_s29] sm:$0xff]  ;;  %v712_v5 = vld [vmem:[%s700_s29 + $0x8] sm:$0xff] }
  0xd0   : > { %v2645_v3 = vld [vmem:[%s705_s28] sm:$0xff]  ;;  %718 = vperm.xlu0 %2100, %v711_v2   ;;  %v2647_v4 = vld [vmem:[%s705_s28 + $0x8] sm:$0xff]  ;;  %v1163_v2 = vld [vmem:[%s2793_s10 + $0x18] sm:$0xff]  ;;  %s2833_s28 = sld [smem:[#allocation24_spill]] }
  0xd1   : > { %1892 = vmatprep.mubr.msk.f32.mxu0 %vm758_vm0, %v2645_v3  ;;  %v1814_v6 = vld [vmem:[%s2831_s24] ss:$0 sm:$0xff]  ;;  %1978 = vmatpush3.bf16.msra.mxu1 %v1975_v19  ;;  %v1061_v46 = vrot.slane %v2645_v3, 4  ;;  %v1062_v47 = vrot.slane %v2647_v4, 4 }
  0xd2   : > { %1893 = vmatmul.mubr.msk.f32.vlgmr.msra.gmra.mrb[0].mxu0 %vm758_vm0, %v2647_v4  ;;  %1917 = vmatprep.subr.mxu1 %v1060_v48 }
  0xd3   : > { %1982 = vmatpush3.bf16.msra.mxu0 %v1979_v22  ;;  %v1063_v49 = vsel %vm736_vm1, %v1061_v46, %v1062_v47  ;;  %v1463_v46 = vld [vmem:[%s2798_s15] sm:$0xff] }
  0xd4   : > { %723 = vperm.xlu0 %2100, %v712_v5   ;;  %1984 = vmatprep.subr.bf16.mxu0 %v1983_v45  ;;  %v1991_v5 = vpack.c.bf16 %v1163_v2, %v1162_v1 }
  0xd6   : > { %s710_s21 = scalar_lea.vmem %s2833_s28, %s2635_s1 }
  0xd7   : > { %1986 = vmatpush3.bf16.msra.mxu0 %v1983_v45 }
  0xd8   : > { %1988 = vmatprep.subr.bf16.mxu0 %v1987_v0 }
 0x14f   : > { %v719_v7 = vpop.permute.xlu0 %718 }
 0x150   : > { %v732_v8 = vmul.f32 %v1814_v6, %v719_v7 }
 0x152   : > { %v737_v13 = vrot.slane %v732_v8, 4 }
 0x153   : > { %v724_v11 = vpop.permute.xlu0 %723 }
 0x154   : > { %v733_v14 = vmul.f32 %v1814_v6, %v724_v11  ;;  %v1255_v11 = vld [vmem:[%s2795_s12 + $0x8] sm:$0xff] }
 0x156   : > { %v738_v15 = vrot.slane %v733_v14, 4 }
 0x158   : > { %v739_v16 = vsel %vm736_vm1, %v737_v13, %v738_v15  ;;  %v1995_v13 = vpack.c.bf16 %v1255_v11, %v1254_v10 }
 0x159   : > { %740 = vrot.lane.b32.xlu1 %v739_v16, %s2329_s18 }
 0x15d   : > { %742 = vrot.lane.b32.xlu1 %v738_v15, %s2329_s18 }
 0x1a5   : > { %v1894_v23 = vpop.f32.mrb[0].mxu0 }
 0x1a6   : > { %v845_v24 = vrot.slane %v1894_v23, 4  ;;  %v831_v25 = vpop.f32.mrb[1].mxu0 }
 0x1a7   : > { %v844_v26 = vrot.slane %v831_v25, 4 }
 0x1a8   : > { %849 = vrot.lane.b32.xlu1 %v845_v24, %s2329_s18 }
 0x1a9   : > { %v846_v27 = vsel %vm736_vm1, %v844_v26, %v845_v24 }
 0x1aa   : > { %847 = vrot.lane.b32.xlu0 %v846_v27, %s2329_s18 }
 0x1cb   : > { %v741_v28 = vpop.permute.xlu1 %740 }
 0x1cc   : > { %v746_v31 = vadd.f32 %v741_v28, %v732_v8 }
 0x1ce   : > { %v755_v34 = vadd.f32 %v1815_v32, %v746_v31 }
 0x1cf   : > { %v743_v29 = vpop.permute.xlu1 %742 }
 0x1d0   : > { %v747_v30 = vadd.f32 %v743_v29, %v733_v14  ;;  %v840_v37 = vadd.f32 %v831_v25, %v755_v34  ;;  %v1823_v14 = vld [vmem:[#allocation9] ss:$0 sm:$0xff]  ;;  %v1362_v34 = vld [vmem:[#allocation12] sm:$0xff] }
 0x1d1   : > { %v1256_v29 = vld [vmem:[%s2795_s12 + $0x10] sm:$0xff] }
 0x1d2   : > { %v756_v33 = vadd.f32 %v1815_v32, %v747_v30  ;;  %v1257_v30 = vld [vmem:[%s2795_s12 + $0x18] sm:$0xff]  ;;  %v1364_v32 = vrot.slane %v2645_v3, 6 }
 0x1d3   : > { %v1999_v31 = vpack.c.bf16 %v1257_v30, %v1256_v29 }
 0x1d4   : > { %v841_v35 = vadd.f32 %v1894_v23, %v756_v33  ;;  %v1365_v33 = vrot.slane %v2647_v4, 6 }
 0x21a   : > { %v850_v36 = vpop.permute.xlu1 %849 }
 0x21b   : > { %v854_v38 = vadd.f32 %v850_v36, %v841_v35  ;;  %v1366_v35 = vsel %vm1363_vm4, %v1364_v32, %v1365_v33  ;;  %v1826_v36 = vld [vmem:[#allocation10] ss:$0 sm:$0xff] }
 0x21c   : > { %v848_v39 = vpop.permute.xlu0 %847 }
 0x21d   : > { %v853_v40 = vadd.f32 %v848_v39, %v840_v37  ;;  %v856_v42 = vmax.f32 %v854_v38, 0.0 }
 0x21f   : > { %v855_v41 = vmax.f32 %v853_v40, 0.0 }
 0x221   : > { %1903 = vmatprep.mubr.msk.f32.mxu1 %vm868_vm2, %v855_v41 }
 0x222   : > { %1904 = vmatmul.mubr.msk.f32.vlgmr.msra.gmra.mrb[0].mxu1 %vm868_vm2, %v856_v42 }
 0x223   : > { %1919 = vmatprep.mubr.msk.f32.mxu1 %vm758_vm0, %v1063_v49  ;;  %1918 = vmatpush3.msra.mxu1 %v1060_v48  ;;  %v1465_v49 = vld [vmem:[%s2798_s15 + $0x10] sm:$0xff] }
 0x224   : > { %1996 = vmatprep.subr.bf16.mxu1 %v1995_v13 }
 0x226   : > { %1920 = vmatmul.mubr.msk.f32.vlgmr.msra.gmra.mrb[2].mxu1 %vm758_vm0, %v1062_v47  ;;  %v1464_v47 = vld [vmem:[%s2798_s15 + $0x8] sm:$0xff] }
 0x227   : > { %1998 = vmatpush3.bf16.msra.mxu1 %v1995_v13  ;;  %v2003_v48 = vpack.c.bf16 %v1464_v47, %v1463_v46  ;;  %v1559_v13 = vld [vmem:[%s2800_s17 + $0x10] sm:$0xff] }
 0x228   : > { %2000 = vmatprep.subr.bf16.mxu1 %v1999_v31 }
 0x22b   : > { %2002 = vmatpush3.bf16.msra.mxu1 %v1999_v31 }
 0x22c   : > { %2004 = vmatprep.subr.bf16.mxu1 %v2003_v48 }
 0x2f5   : > { %v1905_v51 = vpop.f32.mrb[0].mxu1 }
 0x2f6   : > { %v947_v52 = vadd.f32 %v1905_v51, %v1818_v50  ;;  %v941_v53 = vpop.f32.mrb[1].mxu1 }
 0x2f7   : > { %v942_v54 = vadd.f32 %v1818_v50, %v941_v53  ;;  %v1466_v50 = vld [vmem:[%s2798_s15 + $0x18] sm:$0xff] }
 0x2f8   : > { %v951_v56 = vmax.f32 %v947_v52, 0.0  ;;  %v2007_v51 = vpack.c.bf16 %v1466_v50, %v1465_v49 }
 0x2f9   : > { %v950_v55 = vmax.f32 %v942_v54, 0.0  ;;  %v1921_v57 = vpop.f32.mrb[2].mxu1 }
 0x2fa   : > { %v1148_v58 = vrot.slane %v1921_v57, 2  ;;  %v1134_v59 = vpop.f32.mrb[3].mxu1 }
 0x2fb   : > { %1914 = vmatprep.mubr.msk.f32.mxu0 %vm868_vm2, %v950_v55  ;;  %v1147_v60 = vrot.slane %v1134_v59, 2 }
 0x2fc   : > { %1915 = vmatmul.mubr.msk.f32.vlgmr.msra.gmra.mrb[2].mxu0 %vm868_vm2, %v951_v56  ;;  %v1557_v56 = vld [vmem:[%s2800_s17] sm:$0xff] }
 0x2fd   : > { %v1149_v61 = vsel %vm1039_vm3, %v1147_v60, %v1148_v58  ;;  %1990 = vmatpush3.bf16.msra.mxu0 %v1987_v0  ;;  %v1831_v60 = vld [vmem:[%s2797_s14] ss:$0 sm:$0xff] }
 0x2fe   : > { %1992 = vmatprep.subr.bf16.mxu0 %v1991_v5 }
 0x301   : > { %1994 = vmatpush3.bf16.msra.mxu0 %v1991_v5 }
 0x302   : > { %1944 = vmatprep.subr.mxu0 %v1362_v34 }
 0x3cf   : > { %v1916_v6 = vpop.f32.mrb[2].mxu0 }
 0x3d0   : > { %v1041_v7 = vrot.slane %v1916_v6, 2  ;;  %v1028_v8 = vpop.f32.mrb[3].mxu0 }
 0x3d1   : > { %v1040_v9 = vrot.slane %v1028_v8, 2 }
 0x3d2   : > { %1045 = vrot.lane.b32.xlu1 %v1041_v7, %s2329_s18 }
 0x3d3   : > { %v1042_v12 = vsel %vm1039_vm3, %v1040_v9, %v1041_v7 }
 0x3d4   : > { %1043 = vrot.lane.b32.xlu0 %v1042_v12, %s2329_s18 }
 0x3d6   : > { %1152 = vrot.lane.b32.xlu1 %v1148_v58, %s2329_s18 }
 0x3d8   : > { %1150 = vrot.lane.b32.xlu0 %v1149_v61, %s2329_s18 }
 0x444   : > { %v1046_v15 = vpop.permute.xlu1 %1045 }
 0x445   : > { %v1050_v16 = vadd.f32 %v1916_v6, %v1046_v15 }
 0x446   : > { %v1044_v17 = vpop.permute.xlu0 %1043 }
 0x447   : > { %v1059_v18 = vadd.f32 %v1823_v14, %v1050_v16  ;;  %v1049_v19 = vadd.f32 %v1044_v17, %v1028_v8  ;;  %v1834_v16 = vld [vmem:[%s2799_s16] ss:$0 sm:$0xff] }
 0x448   : > { %v1153_v22 = vpop.permute.xlu1 %1152 }
 0x449   : > { %v1058_v20 = vadd.f32 %v1823_v14, %v1049_v19  ;;  %v1144_v21 = vadd.f32 %v1921_v57, %v1059_v18  ;;  %v1558_v57 = vld [vmem:[%s2800_s17 + $0x8] sm:$0xff]  ;;  %v1560_v14 = vld [vmem:[%s2800_s17 + $0x18] sm:$0xff] }
 0x44a   : > { %v1151_v23 = vpop.permute.xlu0 %1150  ;;  %v2015_v15 = vpack.c.bf16 %v1560_v14, %v1559_v13 }
 0x44b   : > { %v1143_v24 = vadd.f32 %v1134_v59, %v1058_v20  ;;  %v1157_v25 = vadd.f32 %v1153_v22, %v1144_v21  ;;  %v2011_v59 = vpack.c.bf16 %v1558_v57, %v1557_v56 }
 0x44d   : > { %v1156_v26 = vadd.f32 %v1151_v23, %v1143_v24  ;;  %v1159_v28 = vmax.f32 %v1157_v25, 0.0  ;;  %v1837_v23 = vld [vmem:[%s2832_s4] ss:$0 sm:$0xff] }
 0x44f   : > { %v1158_v27 = vmax.f32 %v1156_v26, 0.0 }
 0x451   : > { %1930 = vmatprep.mubr.msk.f32.mxu0 %vm868_vm2, %v1158_v27 }
 0x452   : > { %1931 = vmatmul.mubr.msk.f32.vlgmr.msra.gmra.mrb[4].mxu0 %vm868_vm2, %v1159_v28 }
 0x453   : > { %1945 = vmatpush3.msra.mxu0 %v1362_v34  ;;  %1946 = vmatprep.mubr.msk.f32.mxu0 %vm758_vm0, %v1366_v35 }
 0x454   : > { %2012 = vmatprep.subr.bf16.mxu0 %v2011_v59 }
 0x456   : > { %1947 = vmatmul.mubr.msk.f32.vlgmr.msra.gmra.mrb[6].mxu0 %vm758_vm0, %v1365_v33 }
 0x457   : > { %2014 = vmatpush3.bf16.msra.mxu0 %v2011_v59 }
 0x458   : > { %2016 = vmatprep.subr.bf16.mxu0 %v2015_v15 }
 0x45b   : > { %2018 = vmatpush3.bf16.msra.mxu0 %v2015_v15 }
 0x525   : > { %v1932_v37 = vpop.f32.mrb[4].mxu0 }
 0x526   : > { %v1249_v38 = vadd.f32 %v1932_v37, %v1826_v36  ;;  %v1243_v39 = vpop.f32.mrb[5].mxu0 }
 0x527   : > { %v1244_v40 = vadd.f32 %v1826_v36, %v1243_v39 }
 0x528   : > { %v1253_v42 = vmax.f32 %v1249_v38, 0.0 }
 0x529   : > { %v1252_v41 = vmax.f32 %v1244_v40, 0.0  ;;  %v1948_v3 = vpop.f32.mrb[6].mxu0 }
 0x52a   : > { %v1451_v4 = vrot.slane %v1948_v3, 1  ;;  %v1437_v43 = vpop.f32.mrb[7].mxu0 }
 0x52b   : > { %1941 = vmatprep.mubr.msk.f32.mxu1 %vm868_vm2, %v1252_v41  ;;  %v1450_v44 = vrot.slane %v1437_v43, 1 }
 0x52c   : > { %1942 = vmatmul.mubr.msk.f32.vlgmr.msra.gmra.mrb[4].mxu1 %vm868_vm2, %v1253_v42 }
 0x52d   : > { %v1452_v45 = vsel %vm1341_vm5, %v1450_v44, %v1451_v4  ;;  %2006 = vmatpush3.bf16.msra.mxu1 %v2003_v48 }
 0x52e   : > { %2008 = vmatprep.subr.bf16.mxu1 %v2007_v51 }
 0x531   : > { %2010 = vmatpush3.bf16.msra.mxu1 %v2007_v51 }
 0x5ff   : > { %v1943_v52 = vpop.f32.mrb[4].mxu1 }
 0x600   : > { %v1343_v53 = vrot.slane %v1943_v52, 1  ;;  %v1330_v54 = vpop.f32.mrb[5].mxu1 }
 0x601   : > { %v1342_v55 = vrot.slane %v1330_v54, 1 }
 0x602   : > { %1347 = vrot.lane.b32.xlu1 %v1343_v53, %s2329_s18 }
 0x603   : > { %v1344_v58 = vsel %vm1341_vm5, %v1342_v55, %v1343_v53 }
 0x604   : > { %1345 = vrot.lane.b32.xlu0 %v1344_v58, %s2329_s18 }
 0x606   : > { %1455 = vrot.lane.b32.xlu1 %v1451_v4, %s2329_s18 }
 0x608   : > { %1453 = vrot.lane.b32.xlu0 %v1452_v45, %s2329_s18 }
 0x674   : > { %v1348_v61 = vpop.permute.xlu1 %1347 }
 0x675   : > { %v1352_v62 = vadd.f32 %v1943_v52, %v1348_v61 }
 0x676   : > { %v1346_v63 = vpop.permute.xlu0 %1345 }
 0x677   : > { %v1361_v0 = vadd.f32 %v1831_v60, %v1352_v62  ;;  %v1351_v1 = vadd.f32 %v1346_v63, %v1330_v54 }
 0x678   : > { %v1456_v6 = vpop.permute.xlu1 %1455 }
 0x679   : > { %v1360_v2 = vadd.f32 %v1831_v60, %v1351_v1  ;;  %v1447_v5 = vadd.f32 %v1948_v3, %v1361_v0 }
 0x67a   : > { %v1454_v7 = vpop.permute.xlu0 %1453 }
 0x67b   : > { %v1446_v8 = vadd.f32 %v1437_v43, %v1360_v2  ;;  %v1460_v9 = vadd.f32 %v1456_v6, %v1447_v5 }
 0x67d   : > { %v1459_v10 = vadd.f32 %v1454_v7, %v1446_v8  ;;  %v1462_v12 = vmax.f32 %v1460_v9, 0.0 }
 0x67f   : > { %v1461_v11 = vmax.f32 %v1459_v10, 0.0 }
 0x681   : > { %1957 = vmatprep.mubr.msk.f32.mxu1 %vm868_vm2, %v1461_v11 }
 0x682   : > { %1958 = vmatmul.mubr.msk.f32.vlgmr.msra.gmra.mrb[6].mxu1 %vm868_vm2, %v1462_v12 }
 0x755   : > { %v1959_v17 = vpop.f32.mrb[6].mxu1 }
 0x756   : > { %v1552_v18 = vadd.f32 %v1959_v17, %v1834_v16  ;;  %v1546_v19 = vpop.f32.mrb[7].mxu1 }
 0x757   : > { %v1547_v20 = vadd.f32 %v1834_v16, %v1546_v19 }
 0x758   : > { %v1556_v22 = vmax.f32 %v1552_v18, 0.0 }
 0x759   : > { %v1555_v21 = vmax.f32 %v1547_v20, 0.0 }
 0x75b   : > { %1968 = vmatprep.mubr.msk.f32.mxu0 %vm868_vm2, %v1555_v21 }
 0x75c   : > { %1969 = vmatmul.mubr.msk.f32.vlgmr.msra.gmra.mrb[8].mxu0 %vm868_vm2, %v1556_v22 }
 0x82f   : > { %v1970_v24 = vpop.f32.mrb[8].mxu0 }
 0x830   : > { %v1646_v25 = vadd.f32 %v1970_v24, %v1837_v23  ;;  %v1640_v26 = vpop.f32.mrb[9].mxu0 }
 0x831   : > { %v1641_v27 = vadd.f32 %v1837_v23, %v1640_v26 }
 0x832   : > { %1652 = vst.msk [vmem:[%s710_s21 + $0x8] sm:$0x1] %vm1651_vm6, %v1646_v25 }
 0x833   : > { %1650 = vst.msk [vmem:[%s710_s21] sm:$0xff] %vm1649_vm7, %v1641_v27 }
 0x834 PF: > { %s2834_s2 = sld [smem:[#allocation17_spill]] }
 0x83a   : > { %s33_s0 = sadd.s32 1, %s2834_s2  }
 0x83b   : > { %p30_p11 = scmp.ge.s32.totalorder %s33_s0, 4  }
 0x83d   :  { %32 = sbr.rel (!%p30_p11) target bundleno = 12 (0xc), region = 158 }
 0x844   :  { %1674 = vsyncpa [#allocation3], 1 }
 0x845   :  { %1676 = vsyncpa [#allocation3 + $0x1], 1 }
 0x846   :  { %1677 = vsyncpa [#allocation5], 1 }
 0x847   :  { %1678 = vsyncpa [#allocation8], 1 }
 0x848   :  { %1679 = vsyncpa [#allocation11], 1 }

</bundles_post_ra>
